<compile_context>
chip_gen: v5e
topology: v5e:2x2
jax: 0.10.0
libtpu: 0.0.40
codegen_flags: <defaults>
</compile_context>

<pallas_src>
import numpy as np
import jax
import jax.numpy as jnp
from jax import lax
from jax.experimental import pallas as pl
from jax.experimental.pallas import tpu as pltpu

NUM_CHANNELS = 4
BN_EPS = 1e-5
OUT_W = 8                          # narrow output slab; real payload is 3 columns
_INV_SQRT2 = np.float32(1.0 / np.sqrt(2.0))


def _round_up(x, m):
    return ((x + m - 1) // m) * m


# --------------------------------------------------------------------------- #
# Kernel
# --------------------------------------------------------------------------- #
def video_classifier_kernel(x_ref, w1_ref, b1_ref, dw_ref, db_ref, out_ref):
    # x_ref:  [TB, 4E] f32    w1_ref: [4E, Npad] bf16   b1_ref: [1, Npad] f32
    # dw_ref: [Npad, 2] f32   db_ref: [1, 2]     f32    out_ref:[TB, OUT_W] f32
    x = x_ref[...].astype(jnp.bfloat16)          # in-kernel cast (no HBM round-trip)
    # Fused first Linear of both heads; channel-sigmoid + BatchNorm already folded.
    h = jnp.dot(x, w1_ref[...], preferred_element_type=jnp.float32) + b1_ref[...]
    # Exact (erf) GELU, matching PyTorch nn.GELU default.
    h = 0.5 * h * (1.0 + lax.erf(h * _INV_SQRT2))
    # 2-class softmax == sigmoid(logit[1]-logit[0]); both heads' diffs in one matmul.
    d = jnp.dot(h, dw_ref[...], preferred_element_type=jnp.float32) + db_ref[...]
    p1 = jax.nn.sigmoid(d[:, 0:1])               # first head:  P(class 1)
    p2 = jax.nn.sigmoid(d[:, 1:2])               # second head: P(class 1)
    lane = lax.broadcasted_iota(jnp.int32, out_ref.shape, 1)
    out = jnp.where(lane == 0, 1.0 - p1,
          jnp.where(lane == 1, p1 * (1.0 - p2),
          jnp.where(lane == 2, p1 * p2, 0.0)))
    out_ref[...] = out.astype(out_ref.dtype)


# --------------------------------------------------------------------------- #
# Parameters (mirrors PyTorch __init__ / _init_weights)
# --------------------------------------------------------------------------- #
def init_params(key, embedding_dim, hidden_dim):
    in_dim = embedding_dim * NUM_CHANNELS
    h2 = hidden_dim * 2
    ks = jax.random.split(key, 4)

    def kaiming_relu(k, out_f, in_f):            # kaiming_normal_ (fan_in, relu gain)
        std = np.sqrt(2.0 / in_f)
        return jax.random.normal(k, (out_f, in_f), jnp.float32) * std

    return dict(
        channel_weights=jnp.ones((NUM_CHANNELS,), jnp.float32),
        temperature=jnp.float32(1.7),            # unused in forward
        w1a=kaiming_relu(ks[0], h2, in_dim), b1a=jnp.zeros((h2,), jnp.float32),
        w2a=kaiming_relu(ks[1], 2, h2),      b2a=jnp.zeros((2,), jnp.float32),
        w1b=kaiming_relu(ks[2], h2, in_dim), b1b=jnp.zeros((h2,), jnp.float32),
        w2b=kaiming_relu(ks[3], 2, h2),      b2b=jnp.zeros((2,), jnp.float32),
        # fresh BatchNorm1d state (gamma=1, beta=0, running_mean=0, running_var=1)
        bn_gamma=jnp.ones((h2,), jnp.float32), bn_beta=jnp.zeros((h2,), jnp.float32),
        bn_mean=jnp.zeros((h2,), jnp.float32), bn_var=jnp.ones((h2,), jnp.float32),
    )


# --------------------------------------------------------------------------- #
# Weight preprocessing (computed ONCE per params, cached by the caller)
# --------------------------------------------------------------------------- #
def prepare_weights(params):
    """Fold sigmoid(channel_weights) + BatchNorm into the first Linear, fuse heads,
    pad to lane multiples and cast W1 to bf16.  Depends only on params."""
    in_dim = params["w1a"].shape[1]
    h2 = params["w1a"].shape[0]                  # hidden_dim * 2
    n_fused = 2 * h2
    n_pad = _round_up(n_fused, 128)
    emb = in_dim // NUM_CHANNELS

    s = jnp.repeat(jax.nn.sigmoid(params["channel_weights"]), emb)       # [4E]
    bn_scale = params["bn_gamma"] / jnp.sqrt(params["bn_var"] + BN_EPS)
    bn_shift = params["bn_beta"] - params["bn_mean"] * bn_scale

    def fold(w, b):
        wf = (s[:, None] * w.T) * bn_scale[None, :]                      # [4E, 2H]
        bf = b * bn_scale + bn_shift                                     # [2H]
        return wf, bf

    w1a, b1a = fold(params["w1a"], params["b1a"])
    w1b, b1b = fold(params["w1b"], params["b1b"])
    w1 = jnp.concatenate([w1a, w1b], axis=1)                             # [4E, 4H]
    b1 = jnp.concatenate([b1a, b1b])                                     # [4H]
    w1 = jnp.pad(w1, ((0, 0), (0, n_pad - n_fused))).astype(jnp.bfloat16)
    b1 = jnp.pad(b1, (0, n_pad - n_fused))[None, :].astype(jnp.float32)

    # 2-class softmax -> sigmoid(logit diff): block-diagonal diff weights.
    dw = jnp.zeros((n_pad, 2), jnp.float32)
    dw = dw.at[:h2, 0].set(params["w2a"][1] - params["w2a"][0])
    dw = dw.at[h2:n_fused, 1].set(params["w2b"][1] - params["w2b"][0])
    db = jnp.array([[params["b2a"][1] - params["b2a"][0],
                     params["b2b"][1] - params["b2b"][0]]], jnp.float32)

    w1, b1, dw, db = jax.block_until_ready((w1, b1, dw, db))
    return dict(w1=w1, b1=b1, dw=dw, db=db, in_dim=in_dim, n_pad=n_pad)


# --------------------------------------------------------------------------- #
# Tiling / VMEM budgeting
# --------------------------------------------------------------------------- #
def _vmem_budget_bytes():
    # 0.75 * physical VMEM, hard-capped near 100 MiB:
    #   v7x  (64 MiB)  -> ~48 MiB budget
    #   v5e/v6e (128 MiB) -> ~96 MiB budget
    try:
        cap = int(pltpu.get_tpu_info().vmem_capacity_bytes)
    except Exception:
        cap = 128 * 1024 * 1024
    return int(min(cap * 3 // 4, 100 * 1024 * 1024))


def _per_row_vmem_bytes(in_dim, n_pad):
    # double-buffered f32 x tile + out tile, bf16 x copy, ~2 f32 [*, Npad] temps
    return 2 * in_dim * 4 + 2 * OUT_W * 4 + in_dim * 2 + 2 * n_pad * 4


def _choose_tile_b(B, in_dim, n_pad, weight_bytes, budget, max_tile, weight_bufs):
    per_row = _per_row_vmem_bytes(in_dim, n_pad)
    avail = max(budget - weight_bufs * weight_bytes, 1 * 1024 * 1024)
    tile = min(max_tile, max(8, avail // per_row))
    tile = max(8, (tile // 8) * 8)
    b8 = _round_up(B, 8)
    tile = min(tile, b8)
    # Keep >= 2 grid steps when the batch is big enough to split, so
    # dimension_semantics=("parallel",) can shard across both v7x TensorCores.
    if b8 >= 16:
        tile = min(tile, _round_up((b8 + 1) // 2, 8))
    return max(8, tile)


# --------------------------------------------------------------------------- #
# Forward
# --------------------------------------------------------------------------- #
def video_classifier_forward(params, channel_features, *, prepared=None,
                             max_tile_b=1024):
    B, C, E = channel_features.shape
    assert C == NUM_CHANNELS
    if prepared is None:
        prepared = prepare_weights(params)
    w1, b1, dw, db = prepared["w1"], prepared["b1"], prepared["dw"], prepared["db"]
    in_dim, n_pad = prepared["in_dim"], prepared["n_pad"]
    assert in_dim == C * E

    x = channel_features.reshape(B, in_dim).astype(jnp.float32)

    weight_bytes = w1.size * 2 + b1.size * 4 + dw.size * 4 + db.size * 4
    budget = _vmem_budget_bytes()
    # TODO(synk): for extremely large in_dim where the fused W1 alone nears the
    # VMEM budget, add a K-tiled grid axis instead of shrinking tile_b to 8.

    def run(single_buffer_weights):
        weight_bufs = 1 if single_buffer_weights else 2
        tile_b = _choose_tile_b(B, in_dim, n_pad, weight_bytes, budget,
                                int(max_tile_b), weight_bufs)
        b_pad = _round_up(B, tile_b)
        xp = x if b_pad == B else jnp.pad(x, ((0, b_pad - B), (0, 0)))
        grid = (b_pad // tile_b,)

        est = weight_bufs * weight_bytes + tile_b * _per_row_vmem_bytes(in_dim, n_pad)
        vmem_limit = int(min(max(est + est // 4, 32 * 1024 * 1024), budget))

        cost = pl.CostEstimate(
            flops=2 * b_pad * in_dim * n_pad + 2 * b_pad * n_pad * 2,
            transcendentals=b_pad * (n_pad + 2),
            bytes_accessed=(xp.size * 4 + w1.size * 2 + b1.size * 4
                            + dw.size * 4 + db.size * 4 + b_pad * OUT_W * 4),
        )

        def resident(shape):
            # Constant-index, VMEM-resident weight block; request single buffering.
            if single_buffer_weights:
                return pl.BlockSpec(shape, lambda i: (0,) * len(shape),
                                    pipeline_mode=pl.Buffered(1))
            return pl.BlockSpec(shape, lambda i: (0,) * len(shape))

        # TODO(synk): if xprof shows exposed input DMA, bump the x BlockSpec to
        # pipeline_mode=pl.Buffered(3).
        out = pl.pallas_call(
            video_classifier_kernel,
            out_shape=jax.ShapeDtypeStruct((b_pad, OUT_W), jnp.float32),
            grid=grid,
            in_specs=[
                pl.BlockSpec((tile_b, in_dim), lambda i: (i, 0)),   # x (batch-tiled)
                resident((in_dim, n_pad)),                          # fused W1 (bf16)
                resident((1, n_pad)),                               # fused b1
                resident((n_pad, 2)),                               # logit-diff W
                resident((1, 2)),                                   # logit-diff b
            ],
            out_specs=pl.BlockSpec((tile_b, OUT_W), lambda i: (i, 0)),
            compiler_params=pltpu.CompilerParams(
                dimension_semantics=("parallel",),
                vmem_limit_bytes=vmem_limit),
            cost_estimate=cost,
        )(xp, w1, b1, dw, db)
        return out[:B, :3]

    try:
        return run(single_buffer_weights=True)
    except Exception:
        # Fallback if this toolchain rejects pl.Buffered(1) on resident blocks:
        # let the weights double-buffer and re-derive the batch tile for it.
        return run(single_buffer_weights=False)


# --------------------------------------------------------------------------- #
# Pure-JAX f32 reference (same eval semantics) for the correctness check
# --------------------------------------------------------------------------- #
def _reference_forward(params, channel_features):
    B, C, E = channel_features.shape
    w = jax.nn.sigmoid(params["channel_weights"])
    weighted = channel_features * w[None, :, None]
    combined = weighted.reshape(B, C * E)
    bn_scale = params["bn_gamma"] / jnp.sqrt(params["bn_var"] + BN_EPS)
    bn_shift = params["bn_beta"] - params["bn_mean"] * bn_scale

    def head(w1, b1, w2, b2):
        h = combined @ w1.T + b1
        h = h * bn_scale + bn_shift
        h = 0.5 * h * (1.0 + lax.erf(h / np.sqrt(2.0)))
        return jax.nn.softmax(h @ w2.T + b2, axis=-1)

    p1 = head(params["w1a"], params["b1a"], params["w2a"], params["b2a"])
    p2 = head(params["w1b"], params["b1b"], params["w2b"], params["b2b"])
    return jnp.stack([p1[:, 0], p1[:, 1] * p2[:, 0], p1[:, 1] * p2[:, 1]], axis=-1)


if __name__ == "__main__":
    # Small shapes consistent with the module: [batch, num_channels=4, embedding_dim]
    B, E, H = 12, 32, 16
    key = jax.random.PRNGKey(0)
    k_param, k_x = jax.random.split(key)

    params = init_params(k_param, embedding_dim=E, hidden_dim=H)
    x = jax.random.normal(k_x, (B, NUM_CHANNELS, E), jnp.float32)

    prepared = prepare_weights(params)           # folded weights cached across calls
    # B=12 -> padded to 16 with a 2-step batch grid (exercises tiling + tail padding)
    out = video_classifier_forward(params, x, prepared=prepared)
    out = jax.block_until_ready(out)

    ref = jax.block_until_ready(_reference_forward(params, x))
    # bf16 fused-W1 path -> looser tolerance than pure-f32.
    np.testing.assert_allclose(np.asarray(out), np.asarray(ref), rtol=2e-2, atol=2e-2)
    assert out.shape == (B, 3)

    print("KERNEL_OK")
</pallas_src>

<mosaic_0001>
module attributes {stable_mosaic.version = 11 : i64} {
  func.func @video_classifier_kernel(%arg0: i32, %arg1: memref<8x128xf32, #tpu.memory_space<vmem>>, %arg2: memref<128x128xbf16, #tpu.memory_space<vmem>>, %arg3: memref<1x128xf32, #tpu.memory_space<vmem>>, %arg4: memref<128x2xf32, #tpu.memory_space<vmem>>, %arg5: memref<1x2xf32, #tpu.memory_space<vmem>>, %arg6: memref<8x8xf32, #tpu.memory_space<vmem>>) attributes {dimension_semantics = [#tpu.dimension_semantics<parallel>], iteration_bounds = array<i64: 2>, scalar_prefetch = 0 : i64, scratch_operands = 0 : i64, tpu.core_type = #tpu.core_type<tc>, window_params = [{transform_indices = @transform_0, window_bounds = array<i64: 8, 128>}, {pipeline_mode = #tpu.pipeline_mode<synchronous>, transform_indices = @transform_1, window_bounds = array<i64: 128, 128>}, {pipeline_mode = #tpu.pipeline_mode<synchronous>, transform_indices = @transform_2, window_bounds = array<i64: 1, 128>}, {pipeline_mode = #tpu.pipeline_mode<synchronous>, transform_indices = @transform_3, window_bounds = array<i64: 128, 2>}, {pipeline_mode = #tpu.pipeline_mode<synchronous>, transform_indices = @transform_4, window_bounds = array<i64: 1, 2>}, {transform_indices = @transform_5, window_bounds = array<i64: 8, 8>}]} {
    %c0 = arith.constant 0 : index
    %c0_0 = arith.constant 0 : index
    %0 = vector.load %arg1[%c0, %c0_0] : memref<8x128xf32, #tpu.memory_space<vmem>>, vector<8x128xf32>
    %1 = arith.truncf %0 : vector<8x128xf32> to vector<8x128xbf16>
    %c0_1 = arith.constant 0 : index
    %c0_2 = arith.constant 0 : index
    %2 = vector.load %arg2[%c0_1, %c0_2] : memref<128x128xbf16, #tpu.memory_space<vmem>>, vector<128x128xbf16>
    %cst = arith.constant dense<0.000000e+00> : vector<8x128xf32>
    %3 = tpu.matmul %1, %2, %cst {dimension_numbers = #tpu.dot_dimension_numbers<[1], [0], [0], [1], [0, 0, 1, 1], [], []>} : vector<8x128xbf16>, vector<128x128xbf16>, vector<8x128xf32> -> vector<8x128xf32>
    %c0_3 = arith.constant 0 : index
    %c0_4 = arith.constant 0 : index
    %4 = vector.load %arg3[%c0_3, %c0_4] : memref<1x128xf32, #tpu.memory_space<vmem>>, vector<1x128xf32>
    %5 = vector.broadcast %4 : vector<1x128xf32> to vector<8x128xf32>
    %6 = arith.addf %3, %5 : vector<8x128xf32>
    %cst_5 = arith.constant 5.000000e-01 : f32
    %7 = vector.broadcast %cst_5 : f32 to vector<8x128xf32>
    %8 = arith.mulf %7, %6 : vector<8x128xf32>
    %cst_6 = arith.constant 0.707106769 : f32
    %9 = vector.broadcast %cst_6 : f32 to vector<8x128xf32>
    %10 = arith.mulf %6, %9 : vector<8x128xf32>
    %11 = math.erf %10 : vector<8x128xf32>
    %cst_7 = arith.constant 1.000000e+00 : f32
    %12 = vector.broadcast %cst_7 : f32 to vector<8x128xf32>
    %13 = arith.addf %12, %11 : vector<8x128xf32>
    %14 = arith.mulf %8, %13 : vector<8x128xf32>
    %c0_8 = arith.constant 0 : index
    %c0_9 = arith.constant 0 : index
    %15 = vector.load %arg4[%c0_8, %c0_9] : memref<128x2xf32, #tpu.memory_space<vmem>>, vector<128x2xf32>
    %cst_10 = arith.constant dense<0.000000e+00> : vector<8x2xf32>
    %16 = tpu.matmul %14, %15, %cst_10 {dimension_numbers = #tpu.dot_dimension_numbers<[1], [0], [0], [1], [0, 0, 1, 1], [], []>} : vector<8x128xf32>, vector<128x2xf32>, vector<8x2xf32> -> vector<8x2xf32>
    %c0_11 = arith.constant 0 : index
    %c0_12 = arith.constant 0 : index
    %17 = vector.load %arg5[%c0_11, %c0_12] : memref<1x2xf32, #tpu.memory_space<vmem>>, vector<1x2xf32>
    %18 = vector.broadcast %17 : vector<1x2xf32> to vector<8x2xf32>
    %19 = arith.addf %16, %18 : vector<8x2xf32>
    %20 = vector.extract_strided_slice %19 {offsets = [0, 0], sizes = [8, 1], strides = [1, 1]} : vector<8x2xf32> to vector<8x1xf32>
    %21 = arith.negf %20 : vector<8x1xf32>
    %22 = math.exp %21 : vector<8x1xf32>
    %cst_13 = arith.constant 1.000000e+00 : f32
    %23 = vector.broadcast %cst_13 : f32 to vector<8x1xf32>
    %24 = arith.addf %23, %22 : vector<8x1xf32>
    %25 = arith.divf %23, %24 : vector<8x1xf32>
    %26 = vector.extract_strided_slice %19 {offsets = [0, 1], sizes = [8, 1], strides = [1, 1]} : vector<8x2xf32> to vector<8x1xf32>
    %27 = arith.negf %26 : vector<8x1xf32>
    %28 = math.exp %27 : vector<8x1xf32>
    %cst_14 = arith.constant 1.000000e+00 : f32
    %29 = vector.broadcast %cst_14 : f32 to vector<8x1xf32>
    %30 = arith.addf %29, %28 : vector<8x1xf32>
    %31 = arith.divf %29, %30 : vector<8x1xf32>
    %32 = tpu.iota {dimensions = array<i32: 1>} : vector<8x8xi32>
    %c0_i32 = arith.constant 0 : i32
    %33 = vector.broadcast %c0_i32 : i32 to vector<8x8xi32>
    %34 = arith.cmpi eq, %32, %33 : vector<8x8xi32>
    %cst_15 = arith.constant 1.000000e+00 : f32
    %35 = vector.broadcast %cst_15 : f32 to vector<8x1xf32>
    %36 = arith.subf %35, %25 : vector<8x1xf32>
    %c1_i32 = arith.constant 1 : i32
    %37 = vector.broadcast %c1_i32 : i32 to vector<8x8xi32>
    %38 = arith.cmpi eq, %32, %37 : vector<8x8xi32>
    %cst_16 = arith.constant 1.000000e+00 : f32
    %39 = vector.broadcast %cst_16 : f32 to vector<8x1xf32>
    %40 = arith.subf %39, %31 : vector<8x1xf32>
    %41 = arith.mulf %25, %40 : vector<8x1xf32>
    %c2_i32 = arith.constant 2 : i32
    %42 = vector.broadcast %c2_i32 : i32 to vector<8x8xi32>
    %43 = arith.cmpi eq, %32, %42 : vector<8x8xi32>
    %44 = arith.mulf %25, %31 : vector<8x1xf32>
    %cst_17 = arith.constant 0.000000e+00 : f32
    %45 = vector.shape_cast %44 : vector<8x1xf32> to vector<8x1xf32>
    %46 = vector.broadcast %45 : vector<8x1xf32> to vector<8x8xf32>
    %47 = vector.broadcast %cst_17 : f32 to vector<8x8xf32>
    %48 = arith.select %43, %46, %47 : vector<8x8xi1>, vector<8x8xf32>
    %49 = vector.shape_cast %41 : vector<8x1xf32> to vector<8x1xf32>
    %50 = vector.broadcast %49 : vector<8x1xf32> to vector<8x8xf32>
    %51 = arith.select %38, %50, %48 : vector<8x8xi1>, vector<8x8xf32>
    %52 = vector.shape_cast %36 : vector<8x1xf32> to vector<8x1xf32>
    %53 = vector.broadcast %52 : vector<8x1xf32> to vector<8x8xf32>
    %54 = arith.select %34, %53, %51 : vector<8x8xi1>, vector<8x8xf32>
    %c0_18 = arith.constant 0 : index
    %c0_19 = arith.constant 0 : index
    %55 = vector.load %arg6[%c0_18, %c0_19] : memref<8x8xf32, #tpu.memory_space<vmem>>, vector<8x8xf32>
    tpu.vector_store %arg6[%c0_18, %c0_19], %54 {strides = array<i32>} : memref<8x8xf32, #tpu.memory_space<vmem>>, vector<8x8xf32>,
    return
  }
  func.func @transform_0(%arg0: i32) -> (i32, i32) {
    %c0_i32 = arith.constant 0 : i32
    %c0_i32_0 = arith.constant 0 : i32
    return %arg0, %c0_i32 : i32, i32
  }
  func.func @transform_1(%arg0: i32) -> (i32, i32) {
    %c0_i32 = arith.constant 0 : i32
    %c0_i32_0 = arith.constant 0 : i32
    %c0_i32_1 = arith.constant 0 : i32
    return %c0_i32, %c0_i32_0 : i32, i32
  }
  func.func @transform_2(%arg0: i32) -> (i32, i32) {
    %c0_i32 = arith.constant 0 : i32
    %c0_i32_0 = arith.constant 0 : i32
    %c0_i32_1 = arith.constant 0 : i32
    return %c0_i32, %c0_i32_0 : i32, i32
  }
  func.func @transform_3(%arg0: i32) -> (i32, i32) {
    %c0_i32 = arith.constant 0 : i32
    %c0_i32_0 = arith.constant 0 : i32
    %c0_i32_1 = arith.constant 0 : i32
    return %c0_i32, %c0_i32_0 : i32, i32
  }
  func.func @transform_4(%arg0: i32) -> (i32, i32) {
    %c0_i32 = arith.constant 0 : i32
    %c0_i32_0 = arith.constant 0 : i32
    %c0_i32_1 = arith.constant 0 : i32
    return %c0_i32, %c0_i32_0 : i32, i32
  }
  func.func @transform_5(%arg0: i32) -> (i32, i32) {
    %c0_i32 = arith.constant 0 : i32
    %c0_i32_0 = arith.constant 0 : i32
    return %arg0, %c0_i32 : i32, i32
  }
}

module attributes {stable_mosaic.version = 11 : i64} {
  func.func @video_classifier_kernel(%arg0: i32, %arg1: memref<8x128xf32, #tpu.memory_space<vmem>>, %arg2: memref<128x128xbf16, #tpu.memory_space<vmem>>, %arg3: memref<1x128xf32, #tpu.memory_space<vmem>>, %arg4: memref<128x2xf32, #tpu.memory_space<vmem>>, %arg5: memref<1x2xf32, #tpu.memory_space<vmem>>, %arg6: memref<8x8xf32, #tpu.memory_space<vmem>>) attributes {dimension_semantics = [#tpu.dimension_semantics<parallel>], iteration_bounds = array<i64: 2>, scalar_prefetch = 0 : i64, scratch_operands = 0 : i64, tpu.core_type = #tpu.core_type<tc>, window_params = [{transform_indices = @transform_0, window_bounds = array<i64: 8, 128>}, {pipeline_mode = #tpu.pipeline_mode<synchronous>, transform_indices = @transform_1, window_bounds = array<i64: 128, 128>}, {pipeline_mode = #tpu.pipeline_mode<synchronous>, transform_indices = @transform_2, window_bounds = array<i64: 1, 128>}, {pipeline_mode = #tpu.pipeline_mode<synchronous>, transform_indices = @transform_3, window_bounds = array<i64: 128, 2>}, {pipeline_mode = #tpu.pipeline_mode<synchronous>, transform_indices = @transform_4, window_bounds = array<i64: 1, 2>}, {transform_indices = @transform_5, window_bounds = array<i64: 8, 8>}]} {
    %c0 = arith.constant 0 : index
    %c0_0 = arith.constant 0 : index
    %0 = vector.load %arg1[%c0, %c0_0] : memref<8x128xf32, #tpu.memory_space<vmem>>, vector<8x128xf32>
    %1 = arith.truncf %0 : vector<8x128xf32> to vector<8x128xbf16>
    %c0_1 = arith.constant 0 : index
    %c0_2 = arith.constant 0 : index
    %2 = vector.load %arg2[%c0_1, %c0_2] : memref<128x128xbf16, #tpu.memory_space<vmem>>, vector<128x128xbf16>
    %cst = arith.constant dense<0.000000e+00> : vector<8x128xf32>
    %3 = tpu.matmul %1, %2, %cst {dimension_numbers = #tpu.dot_dimension_numbers<[1], [0], [0], [1], [0, 0, 1, 1], [], []>} : vector<8x128xbf16>, vector<128x128xbf16>, vector<8x128xf32> -> vector<8x128xf32>
    %c0_3 = arith.constant 0 : index
    %c0_4 = arith.constant 0 : index
    %4 = vector.load %arg3[%c0_3, %c0_4] : memref<1x128xf32, #tpu.memory_space<vmem>>, vector<1x128xf32>
    %5 = vector.broadcast %4 : vector<1x128xf32> to vector<8x128xf32>
    %6 = arith.addf %3, %5 : vector<8x128xf32>
    %cst_5 = arith.constant 5.000000e-01 : f32
    %7 = vector.broadcast %cst_5 : f32 to vector<8x128xf32>
    %8 = arith.mulf %7, %6 : vector<8x128xf32>
    %cst_6 = arith.constant 0.707106769 : f32
    %9 = vector.broadcast %cst_6 : f32 to vector<8x128xf32>
    %10 = arith.mulf %6, %9 : vector<8x128xf32>
    %11 = math.erf %10 : vector<8x128xf32>
    %cst_7 = arith.constant 1.000000e+00 : f32
    %12 = vector.broadcast %cst_7 : f32 to vector<8x128xf32>
    %13 = arith.addf %12, %11 : vector<8x128xf32>
    %14 = arith.mulf %8, %13 : vector<8x128xf32>
    %c0_8 = arith.constant 0 : index
    %c0_9 = arith.constant 0 : index
    %15 = vector.load %arg4[%c0_8, %c0_9] : memref<128x2xf32, #tpu.memory_space<vmem>>, vector<128x2xf32>
    %cst_10 = arith.constant dense<0.000000e+00> : vector<8x2xf32>
    %16 = tpu.matmul %14, %15, %cst_10 {dimension_numbers = #tpu.dot_dimension_numbers<[1], [0], [0], [1], [0, 0, 1, 1], [], []>} : vector<8x128xf32>, vector<128x2xf32>, vector<8x2xf32> -> vector<8x2xf32>
    %c0_11 = arith.constant 0 : index
    %c0_12 = arith.constant 0 : index
    %17 = vector.load %arg5[%c0_11, %c0_12] : memref<1x2xf32, #tpu.memory_space<vmem>>, vector<1x2xf32>
    %18 = vector.broadcast %17 : vector<1x2xf32> to vector<8x2xf32>
    %19 = arith.addf %16, %18 : vector<8x2xf32>
    %20 = vector.extract_strided_slice %19 {offsets = [0, 0], sizes = [8, 1], strides = [1, 1]} : vector<8x2xf32> to vector<8x1xf32>
    %21 = arith.negf %20 : vector<8x1xf32>
    %22 = math.exp %21 : vector<8x1xf32>
    %cst_13 = arith.constant 1.000000e+00 : f32
    %23 = vector.broadcast %cst_13 : f32 to vector<8x1xf32>
    %24 = arith.addf %23, %22 : vector<8x1xf32>
    %25 = arith.divf %23, %24 : vector<8x1xf32>
    %26 = vector.extract_strided_slice %19 {offsets = [0, 1], sizes = [8, 1], strides = [1, 1]} : vector<8x2xf32> to vector<8x1xf32>
    %27 = arith.negf %26 : vector<8x1xf32>
    %28 = math.exp %27 : vector<8x1xf32>
    %cst_14 = arith.constant 1.000000e+00 : f32
    %29 = vector.broadcast %cst_14 : f32 to vector<8x1xf32>
    %30 = arith.addf %29, %28 : vector<8x1xf32>
    %31 = arith.divf %29, %30 : vector<8x1xf32>
    %32 = tpu.iota {dimensions = array<i32: 1>} : vector<8x8xi32>
    %c0_i32 = arith.constant 0 : i32
    %33 = vector.broadcast %c0_i32 : i32 to vector<8x8xi32>
    %34 = arith.cmpi eq, %32, %33 : vector<8x8xi32>
    %cst_15 = arith.constant 1.000000e+00 : f32
    %35 = vector.broadcast %cst_15 : f32 to vector<8x1xf32>
    %36 = arith.subf %35, %25 : vector<8x1xf32>
    %c1_i32 = arith.constant 1 : i32
    %37 = vector.broadcast %c1_i32 : i32 to vector<8x8xi32>
    %38 = arith.cmpi eq, %32, %37 : vector<8x8xi32>
    %cst_16 = arith.constant 1.000000e+00 : f32
    %39 = vector.broadcast %cst_16 : f32 to vector<8x1xf32>
    %40 = arith.subf %39, %31 : vector<8x1xf32>
    %41 = arith.mulf %25, %40 : vector<8x1xf32>
    %c2_i32 = arith.constant 2 : i32
    %42 = vector.broadcast %c2_i32 : i32 to vector<8x8xi32>
    %43 = arith.cmpi eq, %32, %42 : vector<8x8xi32>
    %44 = arith.mulf %25, %31 : vector<8x1xf32>
    %cst_17 = arith.constant 0.000000e+00 : f32
    %45 = vector.shape_cast %44 : vector<8x1xf32> to vector<8x1xf32>
    %46 = vector.broadcast %45 : vector<8x1xf32> to vector<8x8xf32>
    %47 = vector.broadcast %cst_17 : f32 to vector<8x8xf32>
    %48 = arith.select %43, %46, %47 : vector<8x8xi1>, vector<8x8xf32>
    %49 = vector.shape_cast %41 : vector<8x1xf32> to vector<8x1xf32>
    %50 = vector.broadcast %49 : vector<8x1xf32> to vector<8x8xf32>
    %51 = arith.select %38, %50, %48 : vector<8x8xi1>, vector<8x8xf32>
    %52 = vector.shape_cast %36 : vector<8x1xf32> to vector<8x1xf32>
    %53 = vector.broadcast %52 : vector<8x1xf32> to vector<8x8xf32>
    %54 = arith.select %34, %53, %51 : vector<8x8xi1>, vector<8x8xf32>
    %c0_18 = arith.constant 0 : index
    %c0_19 = arith.constant 0 : index
    %55 = vector.load %arg6[%c0_18, %c0_19] : memref<8x8xf32, #tpu.memory_space<vmem>>, vector<8x8xf32>
    tpu.vector_store %arg6[%c0_18, %c0_19], %54 {strides = array<i32>} : memref<8x8xf32, #tpu.memory_space<vmem>>, vector<8x8xf32>,
    return
  }
  func.func @transform_0(%arg0: i32) -> (i32, i32) {
    %c0_i32 = arith.constant 0 : i32
    %c0_i32_0 = arith.constant 0 : i32
    return %arg0, %c0_i32 : i32, i32
  }
  func.func @transform_1(%arg0: i32) -> (i32, i32) {
    %c0_i32 = arith.constant 0 : i32
    %c0_i32_0 = arith.constant 0 : i32
    %c0_i32_1 = arith.constant 0 : i32
    return %c0_i32, %c0_i32_0 : i32, i32
  }
  func.func @transform_2(%arg0: i32) -> (i32, i32) {
    %c0_i32 = arith.constant 0 : i32
    %c0_i32_0 = arith.constant 0 : i32
    %c0_i32_1 = arith.constant 0 : i32
    return %c0_i32, %c0_i32_0 : i32, i32
  }
  func.func @transform_3(%arg0: i32) -> (i32, i32) {
    %c0_i32 = arith.constant 0 : i32
    %c0_i32_0 = arith.constant 0 : i32
    %c0_i32_1 = arith.constant 0 : i32
    return %c0_i32, %c0_i32_0 : i32, i32
  }
  func.func @transform_4(%arg0: i32) -> (i32, i32) {
    %c0_i32 = arith.constant 0 : i32
    %c0_i32_0 = arith.constant 0 : i32
    %c0_i32_1 = arith.constant 0 : i32
    return %c0_i32, %c0_i32_0 : i32, i32
  }
  func.func @transform_5(%arg0: i32) -> (i32, i32) {
    %c0_i32 = arith.constant 0 : i32
    %c0_i32_0 = arith.constant 0 : i32
    return %arg0, %c0_i32 : i32, i32
  }
}

</mosaic_0001>

<bundles_post_ra>
// kernel: tpu_custom_call.1
= control target key start
LH: loop header
LB: loop body
LE: loop exit
PB: predicated region body
PF: predicated region fallthrough
CT: control target
= control target key end

     0   :  { %s606_s18 = smov 0   ;;  %s708_s0 = inlined_call_operand.vmem [shape: f32[16,128], index: 0, kind: input, shape index: {}]   ;;  %s709_s1 = inlined_call_operand.vmem [shape: bf16[128,128], index: 1, kind: input, shape index: {}]   ;;  %s710_s2 = inlined_call_operand.vmem [shape: f32[1,128], index: 2, kind: input, shape index: {}]   ;;  %s711_s3 = inlined_call_operand.vmem [shape: f32[128,2], index: 3, kind: input, shape index: {}]   ;;  %s712_s4 = inlined_call_operand.vmem [shape: f32[1,2], index: 4, kind: input, shape index: {}]   ;;  %s713_s5 = inlined_call_operand.vmem [shape: f32[16,8], index: 5, kind: output, shape index: {}]  }
   0x1 LB: > { %s494_s19 = sadd.s32 4294967295, %s572_s18   ;;  %p498_p0 = scmp.ge.s32.totalorder %s572_s18, 1  ;;  %s572_s18 = sphi %s606_s18, %s15_s18  }
   0x2   : > { %p186_p1 = scmp.lt.s32.totalorder %s572_s18, 3 }
   0x4   : > { %p187_p2 = pnand %p498_p0, %p186_p1 }
   0x5   : > { %p212_p3 = scmp.lt.s32.totalorder (!%p187_p2), %s494_s19, 1  ;;  %s575_s6 = smov (!%p187_p2), 127  }
   0x6   : > { %190 = sbr.rel (%p187_p2) target bundleno = 621 (0x26d), region = 40 }
   0xb   : > { %v544_v0 = vld [vmem:[%s709_s1 + $0x38] sm:$0xff]  ;;  %v543_v1 = vld [vmem:[%s709_s1 + $0x30] sm:$0xff]  ;;  %v542_v2 = vld [vmem:[%s709_s1 + $0x28] sm:$0xff]  ;;  %s715_s19 = smov (!%p212_p3, %s494_s19), 1  ;;  %vm439_vm11 = vcmask 64512  }
   0xc   : > { %290 = vmatpush.bf16.msra.mxu0 %v544_v0  ;;  %v541_v3 = vld [vmem:[%s709_s1 + $0x20] sm:$0xff]  ;;  %v540_v4 = vld [vmem:[%s709_s1 + $0x18] sm:$0xff]  ;;  %v539_v5 = vld [vmem:[%s709_s1 + $0x10] sm:$0xff]  ;;  %s499_s7 = sshll.u32 %s715_s19, 3 }
   0xd   : > { %v538_v6 = vld [vmem:[%s709_s1 + $0x8] sm:$0xff]  ;;  %s215_s12 = scalar_lea.vmem %s708_s0, %s499_s7  ;;  %v537_v7 = vld [vmem:[%s709_s1] sm:$0xff]  ;;  %v362_v10 = vld [vmem:[%s711_s3 + $0x78] sm:$0xff]  ;;  %s219_s10 = scalar_lea.vmem %s713_s5, %s499_s7 }
   0xe   : > { %v220_v8 = vld [vmem:[%s215_s12] sm:$0xff]  ;;  %367 = vmatpush.msra.mxu1 %v362_v10  ;;  %v361_v11 = vld [vmem:[%s711_s3 + $0x70] sm:$0xff]  ;;  %v360_v12 = vld [vmem:[%s711_s3 + $0x68] sm:$0xff] }
   0xf   : > { %v221_v9 = vpack.c.bf16 %v220_v8, %v220_v8  ;;  %v359_v13 = vld [vmem:[%s711_s3 + $0x60] sm:$0xff]  ;;  %v358_v15 = vld [vmem:[%s711_s3 + $0x58] sm:$0xff]  ;;  %v357_v16 = vld [vmem:[%s711_s3 + $0x50] sm:$0xff] }
  0x10   : > { %291 = vmatpush.bf16.msra.mxu0 %v543_v1  ;;  %368 = vmatpush.msra.mxu1 %v361_v11  ;;  %v558_v14 = vld [vmem:[%s710_s2] ss:$0 sm:$0xff]  ;;  %v356_v18 = vld [vmem:[%s711_s3 + $0x48] sm:$0xff]  ;;  %v354_v22 = vld [vmem:[%s711_s3 + $0x38] sm:$0xff] }
  0x11   : > { %v355_v20 = vld [vmem:[%s711_s3 + $0x40] sm:$0xff]  ;;  %v353_v24 = vld [vmem:[%s711_s3 + $0x30] sm:$0xff]  ;;  %v352_v27 = vld [vmem:[%s711_s3 + $0x28] sm:$0xff] }
  0x12   : > { %369 = vmatpush.msra.mxu1 %v360_v12  ;;  %v351_v30 = vld [vmem:[%s711_s3 + $0x20] sm:$0xff]  ;;  %v350_v33 = vld [vmem:[%s711_s3 + $0x18] sm:$0xff]  ;;  %v349_v36 = vld [vmem:[%s711_s3 + $0x10] sm:$0xff] }
  0x13   : > { %v348_v39 = vld [vmem:[%s711_s3 + $0x8] sm:$0xff]  ;;  %v347_v41 = vld [vmem:[%s711_s3] sm:$0xff] }
  0x14   : > { %292 = vmatpush.bf16.msra.mxu0 %v542_v2  ;;  %370 = vmatpush.msra.mxu1 %v359_v13 }
  0x16   : > { %371 = vmatpush.msra.mxu1 %v358_v15 }
  0x18   : > { %293 = vmatpush.bf16.msra.mxu0 %v541_v3  ;;  %372 = vmatpush.msra.mxu1 %v357_v16 }
  0x1a   : > { %373 = vmatpush.msra.mxu1 %v356_v18 }
  0x1c   : > { %294 = vmatpush.bf16.msra.mxu0 %v540_v4  ;;  %374 = vmatpush.msra.mxu1 %v355_v20 }
  0x1e   : > { %375 = vmatpush.msra.mxu1 %v354_v22 }
  0x20   : > { %295 = vmatpush.bf16.msra.mxu0 %v539_v5  ;;  %376 = vmatpush.msra.mxu1 %v353_v24  ;;  %v559_v5 = vld [vmem:[%s712_s4] ss:$0 sm:$0xff] }
  0x22   : > { %377 = vmatpush.msra.mxu1 %v352_v27  ;;  %v406_v27 = vlaneseq }
  0x24   : > { %296 = vmatpush.bf16.msra.mxu0 %v538_v6  ;;  %378 = vmatpush.msra.mxu1 %v351_v30 }
  0x26   : > { %379 = vmatpush.msra.mxu1 %v350_v33 }
  0x28   : > { %297 = vmatpush.bf16.msra.mxu0 %v537_v7  ;;  %380 = vmatpush.msra.mxu1 %v349_v36  ;;  %v574_v7 = vmov 0  }
  0x29   : > { %556 = vset.pattern.permute.xlu2 %v574_v7  ;;  %555 = vset.pattern.permute.xlu1 %v574_v7 }
  0x2a   : > { %381 = vmatpush.msra.mxu1 %v348_v39  ;;  %557 = vset.pattern.permute.xlu0 %v574_v7 }
  0x2b   : > { %298 = vmatmul.bf16.vlgmr.msra.gmra.mxu0 %v221_v9 }
  0x2c   : > { %382 = vmatpush.msra.mxu1 %v347_v41 }
  0xa8   : > { %v299_v17 = vpop.f32.mrf.mxu0 }
  0xa9   : > { %v300_v19 = vadd.f32 %v558_v14, %v299_v17 }
  0xab   : > { %v304_v21 = vmul.f32 0.70710677, %v300_v19  ;;  %v303_v2 = vmul.f32 0.5, %v300_v19 }
  0xad   : > { %v305_v23 = vmul.f32 %v304_v21, %v304_v21 }
  0xaf   : > { %v306_v25 = vmin.f32 %v305_v23, 16.0 }
  0xb0   : > { %v301_v26 = vpop.f32.mrf.mxu0 }
  0xb1   : > { %v307_v28 = vmul.f32 2.1237322e-06, %v306_v25  ;;  %v318_v29 = vmul.f32 3.8918573e-05, %v306_v25 }
  0xb3   : > { %v308_v31 = vadd.f32 0.00028619796, %v307_v28  ;;  %v319_v32 = vadd.f32 0.001143296, %v318_v29  ;;  %v407_v29 = vand.u32 127, %v406_v27 }
  0xb5   : > { %v309_v34 = vmul.f32 %v308_v31, %v306_v25  ;;  %v320_v35 = vmul.f32 %v319_v32, %v306_v25  ;;  %vm416_vm8 = vcmp.eq.s32.totalorder %v407_v29, 2  ;;  %vm410_vm9 = vcmp.eq.s32.totalorder %v407_v29, 1 }
  0xb6   : > { %vm408_vm10 = vcmp.eq.s32.totalorder %v407_v29, 0 }
  0xb7   : > { %v321_v37 = vadd.f32 0.014752088, %v320_v35  ;;  %v310_v38 = vadd.f32 0.0036580483, %v309_v34 }
  0xb9   : > { %v322_v40 = vmul.f32 %v321_v37, %v306_v25  ;;  %v311_v43 = vmul.f32 %v310_v38, %v306_v25 }
  0xbb   : > { %v323_v42 = vadd.f32 0.112945676, %v322_v40  ;;  %v312_v46 = vadd.f32 0.05243302, %v311_v43 }
  0xbd   : > { %v324_v44 = vmul.f32 %v323_v42, %v306_v25  ;;  %v313_v49 = vmul.f32 %v312_v46, %v306_v25 }
  0xbf   : > { %v325_v45 = vadd.f32 0.4994258, %v324_v44  ;;  %v314_v50 = vadd.f32 0.18741608, %v313_v49 }
  0xc1   : > { %v326_v47 = vmul.f32 %v325_v45, %v306_v25  ;;  %v315_v52 = vmul.f32 %v314_v50, %v306_v25 }
  0xc3   : > { %v327_v48 = vadd.f32 1.0, %v326_v47  ;;  %v316_v56 = vadd.f32 1.1283791, %v315_v52 }
  0xc5   : > { %560 = vrcp.f32 %v327_v48  ;;  %v339_v55 = vand.u32 2147483648, %v327_v48  ;;  %v337_v58 = vand.u32 2147483647, %v327_v48  ;;  %vm333_vm1 = vweird.f32 %v327_v48 }
  0xc6   : > { %v317_v61 = vmul.f32 %v316_v56, %v304_v21 }
  0xc7   : > { %v340_v60 = vor.u32 1.1754944e-38, %v339_v55  ;;  %vm338_vm3 = vcmp.eq.f32.partialorder %v337_v58, 8.507059e+37 }
  0xcb   : > { %v561_v51 = vpop.eup %560 }
  0xcc   : > { %v329_v53 = vmul.f32 %v561_v51, %v327_v48  ;;  %vm334_vm0 = vweird.f32 %v561_v51 }
  0xcd   : > { %vm335_vm2 = vmor %vm333_vm1, %vm334_vm0 }
  0xce   : > { %v330_v54 = vsub.f32 1.0, %v329_v53 }
  0xd0   : > { %v331_v57 = vmul.f32 %v561_v51, %v330_v54 }
  0xd2   : > { %v332_v59 = vadd.f32 %v561_v51, %v331_v57 }
  0xd4   : > { %v336_v62 = vsel %vm335_vm2, %v561_v51, %v332_v59 }
  0xd5   : > { %v341_v63 = vsel %vm338_vm3, %v340_v60, %v336_v62 }
  0xd6   : > { %v342_v0 = vmul.f32 %v341_v63, %v317_v61 }
  0xd8   : > { %v533_v1 = vclamps-f32 %v342_v0, 1.0 }
  0xda   : > { %v345_v3 = vadd.f32 1.0, %v533_v1 }
  0xdc   : > { %v346_v4 = vmul.f32 %v345_v3, %v303_v2 }
  0xde   : > { %383 = vmatmul.f32.vlgmr.msra.gmra.mxu1 %v346_v4 }
 0x15b   : > { %v384_v6 = vpop.f32.mrf.mxu1 }
 0x15c   : > { %v385_v8 = vadd.f32 %v559_v5, %v384_v6 }
 0x15e   : > { %v534_v9 = vmul.f32 -1.442695, %v385_v8 }
 0x160   : > { %562 = vpow2.f32 %v534_v9 }
 0x166   : > { %v563_v10 = vpop.eup %562 }
 0x167   : > { %v390_v11 = vadd.f32 1.0, %v563_v10 }
 0x169   : > { %564 = vrcp.f32 %v390_v11  ;;  %v402_v15 = vand.u32 2147483648, %v390_v11  ;;  %v400_v17 = vand.u32 2147483647, %v390_v11  ;;  %vm396_vm5 = vweird.f32 %v390_v11 }
 0x16b   : > { %v403_v19 = vor.u32 1.1754944e-38, %v402_v15  ;;  %vm401_vm7 = vcmp.eq.f32.partialorder %v400_v17, 8.507059e+37 }
 0x16f   : > { %v565_v12 = vpop.eup %564 }
 0x170   : > { %v392_v13 = vmul.f32 %v565_v12, %v390_v11  ;;  %vm397_vm4 = vweird.f32 %v565_v12 }
 0x171   : > { %vm398_vm6 = vmor %vm396_vm5, %vm397_vm4 }
 0x172   : > { %v393_v14 = vsub.f32 1.0, %v392_v13 }
 0x174   : > { %v394_v16 = vmul.f32 %v565_v12, %v393_v14 }
 0x176   : > { %v395_v18 = vadd.f32 %v565_v12, %v394_v16 }
 0x178   : > { %v399_v20 = vsel %vm398_vm6, %v565_v12, %v395_v18 }
 0x179   : > { %v404_v21 = vsel %vm401_vm7, %v403_v19, %v399_v20 }
 0x17a   : > { %418 = vrot.lane.b32.xlu0 %v404_v21, %s575_s6  ;;  %v409_v22 = vsub.f32 1.0, %v404_v21 }
 0x17c   : > { %435 = vperm.xlu2 %556, %v409_v22  }
 0x182   : > { %412 = vrot.lane.b32.xlu0 %v409_v22, %s575_s6 }
 0x1d6   : > { %v436_v32 = vpop.permute.xlu2 %435 }
 0x1ec   : > { %v419_v23 = vpop.permute.xlu0 %418 }
 0x1ed   : > { %v421_v24 = vmul.f32 %v419_v23, %v404_v21 }
 0x1ef   : > { %424 = vperm.xlu1 %555, %v421_v24  }
 0x1f4   : > { %v413_v25 = vpop.permute.xlu0 %412 }
 0x1f5   : > { %v415_v26 = vmul.f32 %v413_v25, %v404_v21 }
 0x1f7   : > { %430 = vperm.xlu1 %555, %v415_v26  }
 0x261   : > { %v425_v28 = vpop.permute.xlu1 %424 }
 0x262   : > { %v427_v30 = vsel %vm416_vm8, %v425_v28, 0.0 }
 0x269   : > { %v431_v31 = vpop.permute.xlu1 %430 }
 0x26a   : > { %v433_v33 = vsel %vm410_vm9, %v431_v31, %v427_v30 }
 0x26b   : > { %v438_v34 = vsel %vm408_vm10, %v436_v32, %v433_v33 }
 0x26c   : > { %440 = vst.msk [vmem:[%s219_s10] sm:$0xff] %vm439_vm11, %v438_v34 }
 0x26d PF: > { %s15_s18 = sadd.s32 1, %s572_s18  }
 0x26e   : > { %p12_p4 = scmp.ge.s32.totalorder %s15_s18, 4  }
 0x270   :  { %14 = sbr.rel (!%p12_p4) target bundleno = 1 (0x1), region = 70 }

// kernel: tpu_custom_call.1
= control target key start
LH: loop header
LB: loop body
LE: loop exit
PB: predicated region body
PF: predicated region fallthrough
CT: control target
= control target key end

     0   :  { %s606_s18 = smov 0   ;;  %s708_s0 = inlined_call_operand.vmem [shape: f32[16,128], index: 0, kind: input, shape index: {}]   ;;  %s709_s1 = inlined_call_operand.vmem [shape: bf16[128,128], index: 1, kind: input, shape index: {}]   ;;  %s710_s2 = inlined_call_operand.vmem [shape: f32[1,128], index: 2, kind: input, shape index: {}]   ;;  %s711_s3 = inlined_call_operand.vmem [shape: f32[128,2], index: 3, kind: input, shape index: {}]   ;;  %s712_s4 = inlined_call_operand.vmem [shape: f32[1,2], index: 4, kind: input, shape index: {}]   ;;  %s713_s5 = inlined_call_operand.vmem [shape: f32[16,8], index: 5, kind: output, shape index: {}]  }
   0x1 LB: > { %s494_s19 = sadd.s32 4294967295, %s572_s18   ;;  %p498_p0 = scmp.ge.s32.totalorder %s572_s18, 1  ;;  %s572_s18 = sphi %s606_s18, %s15_s18  }
   0x2   : > { %p186_p1 = scmp.lt.s32.totalorder %s572_s18, 3 }
   0x4   : > { %p187_p2 = pnand %p498_p0, %p186_p1 }
   0x5   : > { %p212_p3 = scmp.lt.s32.totalorder (!%p187_p2), %s494_s19, 1  ;;  %s575_s6 = smov (!%p187_p2), 127  }
   0x6   : > { %190 = sbr.rel (%p187_p2) target bundleno = 621 (0x26d), region = 40 }
   0xb   : > { %v544_v0 = vld [vmem:[%s709_s1 + $0x38] sm:$0xff]  ;;  %v543_v1 = vld [vmem:[%s709_s1 + $0x30] sm:$0xff]  ;;  %v542_v2 = vld [vmem:[%s709_s1 + $0x28] sm:$0xff]  ;;  %s715_s19 = smov (!%p212_p3, %s494_s19), 1  ;;  %vm439_vm11 = vcmask 64512  }
   0xc   : > { %290 = vmatpush.bf16.msra.mxu0 %v544_v0  ;;  %v541_v3 = vld [vmem:[%s709_s1 + $0x20] sm:$0xff]  ;;  %v540_v4 = vld [vmem:[%s709_s1 + $0x18] sm:$0xff]  ;;  %v539_v5 = vld [vmem:[%s709_s1 + $0x10] sm:$0xff]  ;;  %s499_s7 = sshll.u32 %s715_s19, 3 }
   0xd   : > { %v538_v6 = vld [vmem:[%s709_s1 + $0x8] sm:$0xff]  ;;  %s215_s12 = scalar_lea.vmem %s708_s0, %s499_s7  ;;  %v537_v7 = vld [vmem:[%s709_s1] sm:$0xff]  ;;  %v362_v10 = vld [vmem:[%s711_s3 + $0x78] sm:$0xff]  ;;  %s219_s10 = scalar_lea.vmem %s713_s5, %s499_s7 }
   0xe   : > { %v220_v8 = vld [vmem:[%s215_s12] sm:$0xff]  ;;  %367 = vmatpush.msra.mxu1 %v362_v10  ;;  %v361_v11 = vld [vmem:[%s711_s3 + $0x70] sm:$0xff]  ;;  %v360_v12 = vld [vmem:[%s711_s3 + $0x68] sm:$0xff] }
   0xf   : > { %v221_v9 = vpack.c.bf16 %v220_v8, %v220_v8  ;;  %v359_v13 = vld [vmem:[%s711_s3 + $0x60] sm:$0xff]  ;;  %v358_v15 = vld [vmem:[%s711_s3 + $0x58] sm:$0xff]  ;;  %v357_v16 = vld [vmem:[%s711_s3 + $0x50] sm:$0xff] }
  0x10   : > { %291 = vmatpush.bf16.msra.mxu0 %v543_v1  ;;  %368 = vmatpush.msra.mxu1 %v361_v11  ;;  %v558_v14 = vld [vmem:[%s710_s2] ss:$0 sm:$0xff]  ;;  %v356_v18 = vld [vmem:[%s711_s3 + $0x48] sm:$0xff]  ;;  %v354_v22 = vld [vmem:[%s711_s3 + $0x38] sm:$0xff] }
  0x11   : > { %v355_v20 = vld [vmem:[%s711_s3 + $0x40] sm:$0xff]  ;;  %v353_v24 = vld [vmem:[%s711_s3 + $0x30] sm:$0xff]  ;;  %v352_v27 = vld [vmem:[%s711_s3 + $0x28] sm:$0xff] }
  0x12   : > { %369 = vmatpush.msra.mxu1 %v360_v12  ;;  %v351_v30 = vld [vmem:[%s711_s3 + $0x20] sm:$0xff]  ;;  %v350_v33 = vld [vmem:[%s711_s3 + $0x18] sm:$0xff]  ;;  %v349_v36 = vld [vmem:[%s711_s3 + $0x10] sm:$0xff] }
  0x13   : > { %v348_v39 = vld [vmem:[%s711_s3 + $0x8] sm:$0xff]  ;;  %v347_v41 = vld [vmem:[%s711_s3] sm:$0xff] }
  0x14   : > { %292 = vmatpush.bf16.msra.mxu0 %v542_v2  ;;  %370 = vmatpush.msra.mxu1 %v359_v13 }
  0x16   : > { %371 = vmatpush.msra.mxu1 %v358_v15 }
  0x18   : > { %293 = vmatpush.bf16.msra.mxu0 %v541_v3  ;;  %372 = vmatpush.msra.mxu1 %v357_v16 }
  0x1a   : > { %373 = vmatpush.msra.mxu1 %v356_v18 }
  0x1c   : > { %294 = vmatpush.bf16.msra.mxu0 %v540_v4  ;;  %374 = vmatpush.msra.mxu1 %v355_v20 }
  0x1e   : > { %375 = vmatpush.msra.mxu1 %v354_v22 }
  0x20   : > { %295 = vmatpush.bf16.msra.mxu0 %v539_v5  ;;  %376 = vmatpush.msra.mxu1 %v353_v24  ;;  %v559_v5 = vld [vmem:[%s712_s4] ss:$0 sm:$0xff] }
  0x22   : > { %377 = vmatpush.msra.mxu1 %v352_v27  ;;  %v406_v27 = vlaneseq }
  0x24   : > { %296 = vmatpush.bf16.msra.mxu0 %v538_v6  ;;  %378 = vmatpush.msra.mxu1 %v351_v30 }
  0x26   : > { %379 = vmatpush.msra.mxu1 %v350_v33 }
  0x28   : > { %297 = vmatpush.bf16.msra.mxu0 %v537_v7  ;;  %380 = vmatpush.msra.mxu1 %v349_v36  ;;  %v574_v7 = vmov 0  }
  0x29   : > { %556 = vset.pattern.permute.xlu2 %v574_v7  ;;  %555 = vset.pattern.permute.xlu1 %v574_v7 }
  0x2a   : > { %381 = vmatpush.msra.mxu1 %v348_v39  ;;  %557 = vset.pattern.permute.xlu0 %v574_v7 }
  0x2b   : > { %298 = vmatmul.bf16.vlgmr.msra.gmra.mxu0 %v221_v9 }
  0x2c   : > { %382 = vmatpush.msra.mxu1 %v347_v41 }
  0xa8   : > { %v299_v17 = vpop.f32.mrf.mxu0 }
  0xa9   : > { %v300_v19 = vadd.f32 %v558_v14, %v299_v17 }
  0xab   : > { %v304_v21 = vmul.f32 0.70710677, %v300_v19  ;;  %v303_v2 = vmul.f32 0.5, %v300_v19 }
  0xad   : > { %v305_v23 = vmul.f32 %v304_v21, %v304_v21 }
  0xaf   : > { %v306_v25 = vmin.f32 %v305_v23, 16.0 }
  0xb0   : > { %v301_v26 = vpop.f32.mrf.mxu0 }
  0xb1   : > { %v307_v28 = vmul.f32 2.1237322e-06, %v306_v25  ;;  %v318_v29 = vmul.f32 3.8918573e-05, %v306_v25 }
  0xb3   : > { %v308_v31 = vadd.f32 0.00028619796, %v307_v28  ;;  %v319_v32 = vadd.f32 0.001143296, %v318_v29  ;;  %v407_v29 = vand.u32 127, %v406_v27 }
  0xb5   : > { %v309_v34 = vmul.f32 %v308_v31, %v306_v25  ;;  %v320_v35 = vmul.f32 %v319_v32, %v306_v25  ;;  %vm416_vm8 = vcmp.eq.s32.totalorder %v407_v29, 2  ;;  %vm410_vm9 = vcmp.eq.s32.totalorder %v407_v29, 1 }
  0xb6   : > { %vm408_vm10 = vcmp.eq.s32.totalorder %v407_v29, 0 }
  0xb7   : > { %v321_v37 = vadd.f32 0.014752088, %v320_v35  ;;  %v310_v38 = vadd.f32 0.0036580483, %v309_v34 }
  0xb9   : > { %v322_v40 = vmul.f32 %v321_v37, %v306_v25  ;;  %v311_v43 = vmul.f32 %v310_v38, %v306_v25 }
  0xbb   : > { %v323_v42 = vadd.f32 0.112945676, %v322_v40  ;;  %v312_v46 = vadd.f32 0.05243302, %v311_v43 }
  0xbd   : > { %v324_v44 = vmul.f32 %v323_v42, %v306_v25  ;;  %v313_v49 = vmul.f32 %v312_v46, %v306_v25 }
  0xbf   : > { %v325_v45 = vadd.f32 0.4994258, %v324_v44  ;;  %v314_v50 = vadd.f32 0.18741608, %v313_v49 }
  0xc1   : > { %v326_v47 = vmul.f32 %v325_v45, %v306_v25  ;;  %v315_v52 = vmul.f32 %v314_v50, %v306_v25 }
  0xc3   : > { %v327_v48 = vadd.f32 1.0, %v326_v47  ;;  %v316_v56 = vadd.f32 1.1283791, %v315_v52 }
  0xc5   : > { %560 = vrcp.f32 %v327_v48  ;;  %v339_v55 = vand.u32 2147483648, %v327_v48  ;;  %v337_v58 = vand.u32 2147483647, %v327_v48  ;;  %vm333_vm1 = vweird.f32 %v327_v48 }
  0xc6   : > { %v317_v61 = vmul.f32 %v316_v56, %v304_v21 }
  0xc7   : > { %v340_v60 = vor.u32 1.1754944e-38, %v339_v55  ;;  %vm338_vm3 = vcmp.eq.f32.partialorder %v337_v58, 8.507059e+37 }
  0xcb   : > { %v561_v51 = vpop.eup %560 }
  0xcc   : > { %v329_v53 = vmul.f32 %v561_v51, %v327_v48  ;;  %vm334_vm0 = vweird.f32 %v561_v51 }
  0xcd   : > { %vm335_vm2 = vmor %vm333_vm1, %vm334_vm0 }
  0xce   : > { %v330_v54 = vsub.f32 1.0, %v329_v53 }
  0xd0   : > { %v331_v57 = vmul.f32 %v561_v51, %v330_v54 }
  0xd2   : > { %v332_v59 = vadd.f32 %v561_v51, %v331_v57 }
  0xd4   : > { %v336_v62 = vsel %vm335_vm2, %v561_v51, %v332_v59 }
  0xd5   : > { %v341_v63 = vsel %vm338_vm3, %v340_v60, %v336_v62 }
  0xd6   : > { %v342_v0 = vmul.f32 %v341_v63, %v317_v61 }
  0xd8   : > { %v533_v1 = vclamps-f32 %v342_v0, 1.0 }
  0xda   : > { %v345_v3 = vadd.f32 1.0, %v533_v1 }
  0xdc   : > { %v346_v4 = vmul.f32 %v345_v3, %v303_v2 }
  0xde   : > { %383 = vmatmul.f32.vlgmr.msra.gmra.mxu1 %v346_v4 }
 0x15b   : > { %v384_v6 = vpop.f32.mrf.mxu1 }
 0x15c   : > { %v385_v8 = vadd.f32 %v559_v5, %v384_v6 }
 0x15e   : > { %v534_v9 = vmul.f32 -1.442695, %v385_v8 }
 0x160   : > { %562 = vpow2.f32 %v534_v9 }
 0x166   : > { %v563_v10 = vpop.eup %562 }
 0x167   : > { %v390_v11 = vadd.f32 1.0, %v563_v10 }
 0x169   : > { %564 = vrcp.f32 %v390_v11  ;;  %v402_v15 = vand.u32 2147483648, %v390_v11  ;;  %v400_v17 = vand.u32 2147483647, %v390_v11  ;;  %vm396_vm5 = vweird.f32 %v390_v11 }
 0x16b   : > { %v403_v19 = vor.u32 1.1754944e-38, %v402_v15  ;;  %vm401_vm7 = vcmp.eq.f32.partialorder %v400_v17, 8.507059e+37 }
 0x16f   : > { %v565_v12 = vpop.eup %564 }
 0x170   : > { %v392_v13 = vmul.f32 %v565_v12, %v390_v11  ;;  %vm397_vm4 = vweird.f32 %v565_v12 }
 0x171   : > { %vm398_vm6 = vmor %vm396_vm5, %vm397_vm4 }
 0x172   : > { %v393_v14 = vsub.f32 1.0, %v392_v13 }
 0x174   : > { %v394_v16 = vmul.f32 %v565_v12, %v393_v14 }
 0x176   : > { %v395_v18 = vadd.f32 %v565_v12, %v394_v16 }
 0x178   : > { %v399_v20 = vsel %vm398_vm6, %v565_v12, %v395_v18 }
 0x179   : > { %v404_v21 = vsel %vm401_vm7, %v403_v19, %v399_v20 }
 0x17a   : > { %418 = vrot.lane.b32.xlu0 %v404_v21, %s575_s6  ;;  %v409_v22 = vsub.f32 1.0, %v404_v21 }
 0x17c   : > { %435 = vperm.xlu2 %556, %v409_v22  }
 0x182   : > { %412 = vrot.lane.b32.xlu0 %v409_v22, %s575_s6 }
 0x1d6   : > { %v436_v32 = vpop.permute.xlu2 %435 }
 0x1ec   : > { %v419_v23 = vpop.permute.xlu0 %418 }
 0x1ed   : > { %v421_v24 = vmul.f32 %v419_v23, %v404_v21 }
 0x1ef   : > { %424 = vperm.xlu1 %555, %v421_v24  }
 0x1f4   : > { %v413_v25 = vpop.permute.xlu0 %412 }
 0x1f5   : > { %v415_v26 = vmul.f32 %v413_v25, %v404_v21 }
 0x1f7   : > { %430 = vperm.xlu1 %555, %v415_v26  }
 0x261   : > { %v425_v28 = vpop.permute.xlu1 %424 }
 0x262   : > { %v427_v30 = vsel %vm416_vm8, %v425_v28, 0.0 }
 0x269   : > { %v431_v31 = vpop.permute.xlu1 %430 }
 0x26a   : > { %v433_v33 = vsel %vm410_vm9, %v431_v31, %v427_v30 }
 0x26b   : > { %v438_v34 = vsel %vm408_vm10, %v436_v32, %v433_v33 }
 0x26c   : > { %440 = vst.msk [vmem:[%s219_s10] sm:$0xff] %vm439_vm11, %v438_v34 }
 0x26d PF: > { %s15_s18 = sadd.s32 1, %s572_s18  }
 0x26e   : > { %p12_p4 = scmp.ge.s32.totalorder %s15_s18, 4  }
 0x270   :  { %14 = sbr.rel (!%p12_p4) target bundleno = 1 (0x1), region = 70 }

</bundles_post_ra>
